<compile_context>
chip_gen: v7x
topology: tpu7x:2x2x1
jax: 0.10.0
libtpu: 0.0.40
codegen_flags: <defaults>
</compile_context>

<pallas_src>
import jax
import jax.numpy as jnp
from jax import lax
from jax.experimental import pallas as pl
from jax.experimental.pallas import tpu as pltpu


def _round_up(x, m):
    return ((x + m - 1) // m) * m


def _silu(x):
    # SiLU = x * sigmoid(x).  (Exact; the approx-EUP reciprocal trick breaks
    # the 1e-4 validation tolerance, so it is deliberately not used.)
    return x * jax.nn.sigmoid(x)


def _pad_to(a, shape):
    a = jnp.asarray(a, jnp.float32)
    return jnp.pad(a, [(0, t - s) for s, t in zip(a.shape, shape)])


def _pad_col(v, rows):
    v = jnp.asarray(v, jnp.float32).reshape(-1)
    return jnp.pad(v, (0, rows - v.shape[0]))


def _tensorcores_per_device():
    """Best-effort megacore detection (v4 / v5p / v7x expose two TensorCores
    per device; v5e / v6e are single-TC).  Conservative fallback: 1."""
    try:
        kind = jax.devices()[0].device_kind.lower()
    except Exception:
        return 1
    if "lite" in kind or "v5e" in kind or "v6e" in kind:
        return 1
    if any(t in kind for t in ("v7", "v5p", "v4")):
        return 2
    return 1


def prepare_params(params):
    """One-time packing of the MLP parameters (hoisted off the hot path).

    params: flat tuple (w0, b0, w1, b1, ..., w_last, b_last), weights stored as
    (fan_in, fan_out), biases as (1, fan_out) — matching torch.nn.Linear.
    Returns pre-transposed / zero-padded arrays + static metadata:
      cols : (max_fo, n_mm + 3) f32  — [w_in | b_in | hidden biases ... | b_out]
      wh   : (n_mm, dp, dp)   f32    — stacked, transposed hidden weights
      wf   : (hp, dp)         f32    — transposed output weight
    Zero padding is exact: padded sublanes stay 0 through SiLU, so results are
    bit-for-bit the unpadded math.
    """
    n_linear = len(params) // 2
    assert n_linear >= 2
    dim = int(params[0].shape[1])
    heads = int(params[-2].shape[1])
    dp = _round_up(dim, 8)       # dim / heads sit on sublanes: 8-alignment only,
    hp = _round_up(heads, 8)     # never padded to 128.
    max_fo = max(dp, hp)
    n_mm = n_linear - 2          # number of hidden Linear(dim, dim) layers

    cols = [_pad_col(params[0], max_fo),          # Linear(1, dim) weight column
            _pad_col(params[1], max_fo)]          # its bias
    for l in range(n_mm):
        cols.append(_pad_col(params[2 * (l + 1) + 1], max_fo))   # hidden biases
    cols.append(_pad_col(params[-1], max_fo))                    # output bias
    cols = jnp.stack(cols, axis=1)                               # (max_fo, n_mm + 3)

    wh = (jnp.stack([_pad_to(jnp.asarray(params[2 * (l + 1)], jnp.float32).T, (dp, dp))
                     for l in range(n_mm)], axis=0)
          if n_mm > 0 else None)                                 # (n_mm, dp, dp)
    wf = _pad_to(jnp.asarray(params[-2], jnp.float32).T, (hp, dp))

    return dict(cols=cols, wh=wh, wf=wf,
                dim=dim, heads=heads, dp=dp, hp=hp, n_mm=n_mm)


def _make_mlp_kernel(j, tm, dp, hp, n_mm):
    """Pass 1: z[:, p] = MLP(j - 1 - p) for the lane tile handled by this step."""
    def kernel(*refs):
        if n_mm > 0:
            cols_ref, wh_ref, wf_ref, z_ref = refs
        else:
            cols_ref, wf_ref, z_ref = refs
            wh_ref = None
        # Relative-position value per lane, generated in-kernel (no HBM input
        # stream) and REVERSED so the epilogue becomes forward-contiguous lane
        # slices.  (int32 iota -> f32 cast is exact for j < 2**24.)
        lane = lax.broadcasted_iota(jnp.int32, (1, tm), 1)
        off = (j - 1) - pl.program_id(0) * tm
        x = (off - lane).astype(jnp.float32)                          # (1, tm)
        # Linear(1, dim) + SiLU: outer-product broadcast on the VPU.
        h = _silu(cols_ref[:dp, 0:1] * x + cols_ref[:dp, 1:2])        # (dp, tm)
        # Hidden Linear(dim, dim) + SiLU layers: MXU, lane-dense.
        for l in range(n_mm):
            h = _silu(jnp.dot(wh_ref[l], h, preferred_element_type=jnp.float32)
                      + cols_ref[:dp, 2 + l:3 + l])
        # Final Linear(dim, heads), no activation.
        z_ref[...] = (jnp.dot(wf_ref[...], h, preferred_element_type=jnp.float32)
                      + cols_ref[:hp, 2 + n_mm:3 + n_mm])
    return kernel


def _make_gather_kernel(i, j, heads, ti, tj, grid_i, grid_j):
    """Pass 2 (fused epilogue): out[h, a, b] = z[h, (i - 1 - a) + b]."""
    static = (grid_i == 1 and grid_j == 1)

    def kernel(z_ref, out_ref):
        if static:
            # 1x1 grid: slice starts are pure Python ints -> fully static.
            for a in range(ti):
                s = (i - 1) - a
                out_ref[:, a, :] = z_ref[:, s:s + tj][:heads].astype(out_ref.dtype)
        else:
            row0 = pl.program_id(0) * ti
            col0 = pl.program_id(1) * tj
            for a in range(ti):
                # Per-row dynamic lane start, read via an in-VMEM slice (z is
                # fully VMEM-resident).  Rows of the masked tail i-block would
                # give a negative start; clamp — those rows are discarded by
                # the partial-block writeback anyway.
                s = jnp.maximum((i - 1) - (row0 + a) + col0, 0)
                out_ref[:, a, :] = z_ref[:, pl.ds(s, tj)][:heads].astype(out_ref.dtype)
    return kernel


def relative_position_bias(i, j, prepared, *, out_dtype=jnp.float32,
                           row_tile=64, col_tile=512):
    """Returns the bias of shape (heads, i, j), matching the PyTorch module.
    Set out_dtype=jnp.bfloat16 to halve the dominant output HBM write if the
    consumer accepts bf16."""
    assert j >= i >= 1
    cols, wh, wf = prepared["cols"], prepared["wh"], prepared["wf"]
    heads, dp, hp, n_mm = (prepared["heads"], prepared["dp"],
                           prepared["hp"], prepared["n_mm"])

    # ---- Pass-2 (epilogue) tiling: i on sublanes, j on lanes. ----
    ti = i if i <= row_tile else _round_up(row_tile, 8)
    tj = j if j <= col_tile else _round_up(col_tile, 128)
    grid_i = pl.cdiv(i, ti)
    grid_j = pl.cdiv(j, tj)

    # ---- Pass-1 tiling over the 2j-1 relative positions (lane axis). ----
    # z must also cover the lanes read by the masked tail j-block.
    n_needed = max(2 * j - 1, (i - 1) + grid_j * tj)
    tcs = _tensorcores_per_device()
    want_tiles = tcs if n_needed >= 256 * tcs else 1   # >=2 steps only pays on megacore
    tm = _round_up(pl.cdiv(n_needed, want_tiles), 128)
    # Dim-dependent cap: activations (~4*dp*tm*4 B) + double-buffered output
    # (2*hp*tm*4 B) must fit the smallest scoped-VMEM budget with headroom
    # (v5e 16 MiB scoped, v7x 32 MiB scoped / 64 MiB physical).
    per_lane_bytes = (4 * dp + 2 * hp) * 4
    tm_cap = max(128, ((12 << 20) // per_lane_bytes) // 128 * 128)
    tm = min(tm, tm_cap)
    num_tiles = pl.cdiv(n_needed, tm)
    n_pad = num_tiles * tm

    # ---- Pass 1: z[h, p] = MLP(j - 1 - p)[h]; lane-dense stores, weights
    # VMEM-resident across steps (constant index_maps).
    mlp_inputs = [cols]
    mlp_specs = [pl.BlockSpec(cols.shape, lambda r: (0, 0))]
    if n_mm > 0:
        mlp_inputs.append(wh)
        mlp_specs.append(pl.BlockSpec(wh.shape, lambda r: (0, 0, 0)))
    mlp_inputs.append(wf)
    mlp_specs.append(pl.BlockSpec(wf.shape, lambda r: (0, 0)))

    z_pad = pl.pallas_call(
        _make_mlp_kernel(j, tm, dp, hp, n_mm),
        out_shape=jax.ShapeDtypeStruct((hp, n_pad), jnp.float32),
        grid=(num_tiles,),
        in_specs=mlp_specs,
        out_specs=pl.BlockSpec((hp, tm), lambda r: (0, r)),
        compiler_params=pltpu.CompilerParams(dimension_semantics=("parallel",)),
    )(*mlp_inputs)

    # ---- Pass 2: fused rel-pos gather.  z (hp * n_pad * 4 B, ~0.5 MiB even at
    # j=16k) stays whole in VMEM; each grid step writes a (heads, ti, tj) block
    # of the final output directly — no XLA gather, no transpose copy.
    out = pl.pallas_call(
        _make_gather_kernel(i, j, heads, ti, tj, grid_i, grid_j),
        out_shape=jax.ShapeDtypeStruct((heads, i, j), out_dtype),
        grid=(grid_i, grid_j),
        in_specs=[pl.BlockSpec((hp, n_pad), lambda a, b: (0, 0))],
        out_specs=pl.BlockSpec((heads, ti, tj), lambda a, b: (0, a, b)),
        compiler_params=pltpu.CompilerParams(
            dimension_semantics=("parallel", "parallel")),
    )(z_pad)
    return out


def init_params(key, dim, heads, layers=3):
    """Deterministic init mimicking torch.nn.Linear defaults (U(-k, k), k=1/sqrt(fan_in)).
    Weights stored as (fan_in, fan_out), biases as (1, fan_out)."""
    shapes = [(1, dim)] + [(dim, dim)] * (layers - 1) + [(dim, heads)]
    params = []
    for fan_in, fan_out in shapes:
        key, kw, kb = jax.random.split(key, 3)
        k = 1.0 / jnp.sqrt(jnp.float32(fan_in))
        w = jax.random.uniform(kw, (fan_in, fan_out), jnp.float32, -k, k)
        b = jax.random.uniform(kb, (1, fan_out), jnp.float32, -k, k)
        params += [w, b]
    return tuple(params)


def _reference(i, j, params):
    """Pure-JAX transcription of the PyTorch forward."""
    n_linear = len(params) // 2
    x = jnp.arange(-j + 1, j, dtype=jnp.float32).reshape(-1, 1)
    h = x
    for l in range(n_linear - 1):
        h = _silu(h @ params[2 * l] + params[2 * l + 1])
    y = h @ params[-2] + params[-1]
    i_pos = jnp.arange(i) + (j - i)
    j_pos = jnp.arange(j)
    rel_pos = i_pos[:, None] - j_pos[None, :] + (j - 1)
    return jnp.transpose(y[rel_pos], (2, 0, 1))


if __name__ == "__main__":
    dim, heads, layers = 32, 4, 3
    params = init_params(jax.random.PRNGKey(0), dim, heads, layers)
    prepared = prepare_params(params)          # one-time packing, off the hot path

    # Primary small case (i != j exercises the relative-position offset).
    i, j = 8, 12
    out = jax.block_until_ready(relative_position_bias(i, j, prepared))
    ref = _reference(i, j, params)
    assert out.shape == (heads, i, j), out.shape
    assert jnp.allclose(out, ref, atol=1e-4, rtol=1e-4), "mismatch vs reference"

    # Square case.
    i2, j2 = 7, 7
    out2 = jax.block_until_ready(relative_position_bias(i2, j2, prepared))
    ref2 = _reference(i2, j2, params)
    assert out2.shape == (heads, i2, j2), out2.shape
    assert jnp.allclose(out2, ref2, atol=1e-4, rtol=1e-4), "mismatch vs reference (square)"

    print("KERNEL_OK")
</pallas_src>

<mosaic_0001>
module attributes {stable_mosaic.version = 11 : i64} {
  func.func @kernel(%arg0: i32, %arg1: memref<32x5xf32, #tpu.memory_space<vmem>>, %arg2: memref<2x32x32xf32, #tpu.memory_space<vmem>>, %arg3: memref<8x32xf32, #tpu.memory_space<vmem>>, %arg4: memref<8x128xf32, #tpu.memory_space<vmem>>) attributes {dimension_semantics = [#tpu.dimension_semantics<parallel>], iteration_bounds = array<i64: 1>, scalar_prefetch = 0 : i64, scratch_operands = 0 : i64, tpu.core_type = #tpu.core_type<tc>, window_params = [{pipeline_mode = #tpu.pipeline_mode<synchronous>, transform_indices = @transform_0, window_bounds = array<i64: 32, 5>}, {pipeline_mode = #tpu.pipeline_mode<synchronous>, transform_indices = @transform_1, window_bounds = array<i64: 2, 32, 32>}, {pipeline_mode = #tpu.pipeline_mode<synchronous>, transform_indices = @transform_2, window_bounds = array<i64: 8, 32>}, {transform_indices = @transform_3, window_bounds = array<i64: 8, 128>}]} {
    %0 = tpu.iota {dimensions = array<i32: 1>} : vector<1x128xi32>
    %c128_i32 = arith.constant 128 : i32
    %1 = arith.muli %arg0, %c128_i32 : i32
    %c11_i32 = arith.constant 11 : i32
    %2 = arith.subi %c11_i32, %1 : i32
    %3 = vector.broadcast %2 : i32 to vector<1x128xi32>
    %4 = arith.subi %3, %0 : vector<1x128xi32>
    %5 = arith.sitofp %4 : vector<1x128xi32> to vector<1x128xf32>
    %c0 = arith.constant 0 : index
    %c0_0 = arith.constant 0 : index
    %6 = vector.load %arg1[%c0, %c0_0] : memref<32x5xf32, #tpu.memory_space<vmem>>, vector<32x1xf32>
    %7 = vector.broadcast %6 : vector<32x1xf32> to vector<32x128xf32>
    %8 = vector.broadcast %5 : vector<1x128xf32> to vector<32x128xf32>
    %9 = arith.mulf %7, %8 : vector<32x128xf32>
    %c0_1 = arith.constant 0 : index
    %c1 = arith.constant 1 : index
    %10 = vector.load %arg1[%c0_1, %c1] : memref<32x5xf32, #tpu.memory_space<vmem>>, vector<32x1xf32>
    %11 = vector.broadcast %10 : vector<32x1xf32> to vector<32x128xf32>
    %12 = arith.addf %9, %11 : vector<32x128xf32>
    %13 = arith.negf %12 : vector<32x128xf32>
    %14 = math.exp %13 : vector<32x128xf32>
    %cst = arith.constant 1.000000e+00 : f32
    %15 = vector.broadcast %cst : f32 to vector<32x128xf32>
    %16 = arith.addf %15, %14 : vector<32x128xf32>
    %17 = arith.divf %15, %16 : vector<32x128xf32>
    %18 = arith.mulf %12, %17 : vector<32x128xf32>
    %c0_2 = arith.constant 0 : index
    %c0_3 = arith.constant 0 : index
    %c0_4 = arith.constant 0 : index
    %19 = vector.load %arg2[%c0_2, %c0_3, %c0_4] : memref<2x32x32xf32, #tpu.memory_space<vmem>>, vector<1x32x32xf32>
    %20 = vector.shape_cast %19 : vector<1x32x32xf32> to vector<32x32xf32>
    %cst_5 = arith.constant dense<0.000000e+00> : vector<32x128xf32>
    %21 = tpu.matmul %20, %18, %cst_5 {dimension_numbers = #tpu.dot_dimension_numbers<[1], [0], [0], [1], [0, 0, 1, 1], [], []>} : vector<32x32xf32>, vector<32x128xf32>, vector<32x128xf32> -> vector<32x128xf32>
    %c0_6 = arith.constant 0 : index
    %c2 = arith.constant 2 : index
    %22 = vector.load %arg1[%c0_6, %c2] : memref<32x5xf32, #tpu.memory_space<vmem>>, vector<32x1xf32>
    %23 = vector.broadcast %22 : vector<32x1xf32> to vector<32x128xf32>
    %24 = arith.addf %21, %23 : vector<32x128xf32>
    %25 = arith.negf %24 : vector<32x128xf32>
    %26 = math.exp %25 : vector<32x128xf32>
    %cst_7 = arith.constant 1.000000e+00 : f32
    %27 = vector.broadcast %cst_7 : f32 to vector<32x128xf32>
    %28 = arith.addf %27, %26 : vector<32x128xf32>
    %29 = arith.divf %27, %28 : vector<32x128xf32>
    %30 = arith.mulf %24, %29 : vector<32x128xf32>
    %c1_8 = arith.constant 1 : index
    %c0_9 = arith.constant 0 : index
    %c0_10 = arith.constant 0 : index
    %31 = vector.load %arg2[%c1_8, %c0_9, %c0_10] : memref<2x32x32xf32, #tpu.memory_space<vmem>>, vector<1x32x32xf32>
    %32 = vector.shape_cast %31 : vector<1x32x32xf32> to vector<32x32xf32>
    %cst_11 = arith.constant dense<0.000000e+00> : vector<32x128xf32>
    %33 = tpu.matmul %32, %30, %cst_11 {dimension_numbers = #tpu.dot_dimension_numbers<[1], [0], [0], [1], [0, 0, 1, 1], [], []>} : vector<32x32xf32>, vector<32x128xf32>, vector<32x128xf32> -> vector<32x128xf32>
    %c0_12 = arith.constant 0 : index
    %c3 = arith.constant 3 : index
    %34 = vector.load %arg1[%c0_12, %c3] : memref<32x5xf32, #tpu.memory_space<vmem>>, vector<32x1xf32>
    %35 = vector.broadcast %34 : vector<32x1xf32> to vector<32x128xf32>
    %36 = arith.addf %33, %35 : vector<32x128xf32>
    %37 = arith.negf %36 : vector<32x128xf32>
    %38 = math.exp %37 : vector<32x128xf32>
    %cst_13 = arith.constant 1.000000e+00 : f32
    %39 = vector.broadcast %cst_13 : f32 to vector<32x128xf32>
    %40 = arith.addf %39, %38 : vector<32x128xf32>
    %41 = arith.divf %39, %40 : vector<32x128xf32>
    %42 = arith.mulf %36, %41 : vector<32x128xf32>
    %c0_14 = arith.constant 0 : index
    %c0_15 = arith.constant 0 : index
    %43 = vector.load %arg3[%c0_14, %c0_15] : memref<8x32xf32, #tpu.memory_space<vmem>>, vector<8x32xf32>
    %cst_16 = arith.constant dense<0.000000e+00> : vector<8x128xf32>
    %44 = tpu.matmul %43, %42, %cst_16 {dimension_numbers = #tpu.dot_dimension_numbers<[1], [0], [0], [1], [0, 0, 1, 1], [], []>} : vector<8x32xf32>, vector<32x128xf32>, vector<8x128xf32> -> vector<8x128xf32>
    %c0_17 = arith.constant 0 : index
    %c4 = arith.constant 4 : index
    %45 = vector.load %arg1[%c0_17, %c4] : memref<32x5xf32, #tpu.memory_space<vmem>>, vector<8x1xf32>
    %46 = vector.broadcast %45 : vector<8x1xf32> to vector<8x128xf32>
    %47 = arith.addf %44, %46 : vector<8x128xf32>
    %c0_18 = arith.constant 0 : index
    %c0_19 = arith.constant 0 : index
    %48 = vector.load %arg4[%c0_18, %c0_19] : memref<8x128xf32, #tpu.memory_space<vmem>>, vector<8x128xf32>
    tpu.vector_store %arg4[%c0_18, %c0_19], %47 {strides = array<i32>} : memref<8x128xf32, #tpu.memory_space<vmem>>, vector<8x128xf32>,
    return
  }
  func.func @transform_0(%arg0: i32) -> (i32, i32) {
    %c0_i32 = arith.constant 0 : i32
    %c0_i32_0 = arith.constant 0 : i32
    %c0_i32_1 = arith.constant 0 : i32
    return %c0_i32, %c0_i32_0 : i32, i32
  }
  func.func @transform_1(%arg0: i32) -> (i32, i32, i32) {
    %c0_i32 = arith.constant 0 : i32
    %c0_i32_0 = arith.constant 0 : i32
    %c0_i32_1 = arith.constant 0 : i32
    %c0_i32_2 = arith.constant 0 : i32
    return %c0_i32, %c0_i32_0, %c0_i32_1 : i32, i32, i32
  }
  func.func @transform_2(%arg0: i32) -> (i32, i32) {
    %c0_i32 = arith.constant 0 : i32
    %c0_i32_0 = arith.constant 0 : i32
    %c0_i32_1 = arith.constant 0 : i32
    return %c0_i32, %c0_i32_0 : i32, i32
  }
  func.func @transform_3(%arg0: i32) -> (i32, i32) {
    %c0_i32 = arith.constant 0 : i32
    %c0_i32_0 = arith.constant 0 : i32
    return %c0_i32, %arg0 : i32, i32
  }
}

</mosaic_0001>

<bundles_post_ra>
// kernel: tpu_custom_call.1
= control target key start
LH: loop header
LB: loop body
LE: loop exit
PB: predicated region body
PF: predicated region fallthrough
CT: control target
= control target key end

     0   :  { %8 = vsyncpa [#allocation3], 0  ;;  %s827_s0 = inlined_call_operand.vmem [shape: f32[32,5], index: 0, kind: input, shape index: {}]   ;;  %s828_s1 = inlined_call_operand.hbm [shape: f32[2,32,32], index: 1, kind: input, shape index: {}]   ;;  %s829_s2 = inlined_call_operand.vmem [shape: f32[8,32], index: 2, kind: input, shape index: {}]   ;;  %s830_s3 = inlined_call_operand.hbm [shape: f32[8,128], index: 3, kind: output, shape index: {}]  }
   0x1   :  { %9 = vsyncpa [#allocation4], 0  ;;  %s722_s12 = smov [#allocation2]   ;;  %s674_s16 = scalar_lea.hbm %s828_s1, 1024 }
   0x2   :  { %s17_s13 = sshll.u32 %s722_s12, 4  ;;  %p675_p0 = scmp.ne.s32.totalorder %s828_s1, %s674_s16  ;;  %s18_s13 = int_to_ptr.vmem [resolvable:$true] %s17_s13 }
   0x3   :  { %p678_p1 = scmp.lt.u32.totalorder %s674_s16, %s828_s1 }
   0x5   :  { %p680_p2 = pnand %p678_p1, %p675_p0 }
   0x7   :  { %683 = shalt.err (!%p680_p2)
}
   0x8   :  { %s684_s21 = scalar_lea.vmem %s18_s13, 1024  ;;  %p689_p4 = scmp.lt.s32.totalorder %s18_s13, %s18_s13 }
   0x9   :  { %p685_p3 = scmp.ne.s32.totalorder %s18_s13, %s684_s21  ;;  %p690_p5 = scmp.lt.s32.totalorder %s684_s21, %s684_s21 }
   0xb   :  { %p691_p6 = por %p690_p5, %p689_p4 }
   0xd   :  { %p692_p7 = pnand %p691_p6, %p685_p3 }
   0xf   :  { %695 = shalt.err (!%p692_p7)
}
  0x10   :  { %s723_s22 = smov 128   ;;  %s724_s23 = smov 8  }
  0x11   :  { %23 = dma.hbm_to_vmem [thread:$0]  %s828_s1, 1024, %s18_s13, [#allocation3], %s723_s22, %s723_s22, %s724_s23  }
  0x12   :  { %718 = dma.done.wait [#allocation3], 1024  }
  0x13   :  { %719 = vsyncadd [#allocation3], 4294966272  ;;  %v725_v0 = vmov 1   ;;  %v726_v1 = vmov 0   ;;  %v769_v2 = vld [vmem:[%s827_s0] sm:$0xff]  ;;  %v776_v3 = vld [vmem:[%s827_s0 + $0x8] sm:$0xff]  ;;  %v29_v8 = vlaneseq }
  0x14   :  { %616 = vset.pattern.permute.xlu1 %v725_v0  ;;  %615 = vset.pattern.permute.xlu0 %v726_v1  ;;  %v783_v4 = vld [vmem:[%s827_s0 + $0x10] sm:$0xff]  ;;  %v788_v5 = vld [vmem:[%s827_s0 + $0x18] sm:$0xff]  ;;  %v112_v6 = vld [vmem:[#allocation2] sm:$0xff]  ;;  %vm132_vm0 = vcmask 261120   ;;  %v727_v7 = vmov 2   ;;  %v728_v54 = vmov 3  }
  0x15   :  { %65 = vperm.xlu1 %616, %v769_v2   ;;  %42 = vperm.xlu0 %615, %v769_v2   ;;  %v30_v9 = vand.u32 127, %v29_v8  ;;  %v113_v50 = vld [vmem:[#allocation2 + $0x8] sm:$0xff]  ;;  %v114_v51 = vld [vmem:[#allocation2 + $0x10] sm:$0xff]  ;;  %v115_v52 = vld [vmem:[#allocation2 + $0x18] sm:$0xff]  ;;  %vm730_vm1 = vmmov 0   ;;  %s733_s7 = smov [#allocation5]  }
  0x16   :  { %550 = vmatprep.mubr.msk.f32.mxu0 %vm132_vm0, %v112_v6  ;;  %v259_v53 = vld [vmem:[#allocation2 + $0x20] sm:$0xff]  ;;  %s491_s8 = sshll.u32 %s733_s7, 4  ;;  %s492_s8 = int_to_ptr.vmem [resolvable:$true] %s491_s8 }
  0x17   :  { %v34_v10 = vsub.s32 11, %v30_v9  ;;  %564 = vmatprep.mubr.msk.f32.mxu1 %vm132_vm0, %v259_v53  ;;  %s696_s9 = scalar_lea.vmem %s492_s8, 128  ;;  %p701_p9 = scmp.lt.s32.totalorder %s492_s8, %s492_s8 }
  0x18   :  { %p697_p8 = scmp.ne.s32.totalorder %s492_s8, %s696_s9  ;;  %p702_p10 = scmp.lt.s32.totalorder %s696_s9, %s696_s9 }
  0x19   :  { %69 = vperm.xlu1 %616, %v776_v3   ;;  %47 = vperm.xlu0 %615, %v776_v3   ;;  %v35_v11 = vcvt.s32.f32 %v34_v10 }
  0x1a   :  { %p703_p11 = por %p702_p10, %p701_p9 }
  0x1c   :  { %p704_p12 = pnand %p703_p11, %p697_p8 }
  0x1d   :  { %617 = vset.pattern.permute.xlu1 %v726_v1  ;;  %52 = vperm.xlu0 %615, %v783_v4  }
  0x1e   :  { %57 = vperm.xlu1 %617, %v788_v5  }
  0x21   :  { %618 = vset.pattern.permute.xlu0 %v725_v0 }
  0x22   :  { %619 = vset.pattern.permute.xlu1 %v725_v0  ;;  %73 = vperm.xlu0 %618, %v783_v4  }
  0x23   :  { %77 = vperm.xlu1 %619, %v788_v5  }
  0x26   :  { %621 = vset.pattern.permute.xlu0 %v727_v7 }
  0x27   :  { %620 = vset.pattern.permute.xlu1 %v727_v7  ;;  %121 = vperm.xlu0 %621, %v776_v3  }
  0x28   :  { %117 = vperm.xlu1 %620, %v769_v2  }
  0x2b   :  { %622 = vset.pattern.permute.xlu0 %v728_v54 }
  0x2c   :  { %125 = vperm.xlu1 %620, %v783_v4   ;;  %264 = vperm.xlu0 %622, %v769_v2  }
  0x30   :  { %129 = vperm.xlu1 %620, %v788_v5   ;;  %276 = vperm.xlu0 %622, %v788_v5  }
  0x34   :  { %623 = vset.pattern.permute.xlu1 %v728_v54 }
  0x35   :  { %268 = vperm.xlu1 %623, %v776_v3  }
  0x39   :  { %272 = vperm.xlu1 %623, %v783_v4  }
  0x94   :  { %v66_v12 = vpop.permute.xlu1 %65  ;;  %v43_v13 = vpop.permute.xlu0 %42 }
  0x95   :  { %v60_v14 = vmul.f32 %v43_v13, %v35_v11 }
  0x97   :  { %v80_v15 = vadd.f32 %v66_v12, %v60_v14 }
  0x98   :  { %v70_v16 = vpop.permute.xlu1 %69  ;;  %v48_v17 = vpop.permute.xlu0 %47 }
  0x99   :  { %v500_v18 = vmul.f32 -1.442695, %v80_v15  ;;  %v61_v19 = vmul.f32 %v48_v17, %v35_v11 }
  0x9b   :  { %626 = vpow2.f32 %v500_v18  ;;  %v81_v20 = vadd.f32 %v70_v16, %v61_v19 }
  0x9c   :  { %v53_v21 = vpop.permute.xlu0 %52 }
  0x9d   :  { %v501_v22 = vmul.f32 -1.442695, %v81_v20  ;;  %v58_v23 = vpop.permute.xlu1 %57  ;;  %v62_v24 = vmul.f32 %v53_v21, %v35_v11 }
  0x9e   :  { %v63_v25 = vmul.f32 %v58_v23, %v35_v11 }
  0x9f   :  { %628 = vpow2.f32 %v501_v22 }
  0xa1   :  { %v74_v26 = vpop.permute.xlu0 %73 }
  0xa2   :  { %v82_v27 = vadd.f32 %v74_v26, %v62_v24  ;;  %v78_v28 = vpop.permute.xlu1 %77  ;;  %v260_v26 = vld [vmem:[#allocation2 + $0x28] sm:$0xff] }
  0xa3   :  { %v83_v29 = vadd.f32 %v78_v28, %v63_v25  ;;  %v262_v28 = vld [vmem:[#allocation2 + $0x38] sm:$0xff] }
  0xa4   :  { %v502_v30 = vmul.f32 -1.442695, %v82_v27 }
  0xa5   :  { %v627_v31 = vpop.eup %626  ;;  %v503_v32 = vmul.f32 -1.442695, %v83_v29 }
  0xa6   :  { %v96_v33 = vadd.f32 1.0, %v627_v31  ;;  %630 = vpow2.f32 %v502_v30  ;;  %v122_v57 = vpop.permute.xlu0 %121  ;;  %v731_v30 = vmov 0.0   ;;  %v732_v31 = vmov 4  }
  0xa7   :  { %632 = vpow2.f32 %v503_v32  ;;  %v118_v55 = vpop.permute.xlu1 %117  ;;  %624 = vset.pattern.permute.xlu1 %v732_v31  ;;  %625 = vset.pattern.permute.xlu0 %v732_v31 }
  0xa8   :  { %634 = vrcp.f32 %v96_v33  ;;  %408 = vperm.xlu1 %624, %v769_v2  }
  0xa9   :  { %v629_v34 = vpop.eup %628 }
  0xaa   :  { %v97_v35 = vadd.f32 1.0, %v629_v34 }
  0xab   :  { %v126_v56 = vpop.permute.xlu1 %125  ;;  %v265_v32 = vpop.permute.xlu0 %264 }
  0xac   :  { %636 = vrcp.f32 %v97_v35 }
  0xaf   :  { %v130_v63 = vpop.permute.xlu1 %129 }
  0xb0   :  { %v631_v36 = vpop.eup %630 }
  0xb1   :  { %v633_v37 = vpop.eup %632  ;;  %v98_v38 = vadd.f32 1.0, %v631_v36 }
  0xb2   :  { %v99_v39 = vadd.f32 1.0, %v633_v37  ;;  %v635_v40 = vpop.eup %634 }
  0xb3   :  { %638 = vrcp.f32 %v98_v38  ;;  %v108_v42 = vmul.f32 %v635_v40, %v80_v15  ;;  %v277_v40 = vpop.permute.xlu0 %276 }
  0xb4   :  { %640 = vrcp.f32 %v99_v39  ;;  %v269_v33 = vpop.permute.xlu1 %268 }
  0xb6   :  { %v637_v41 = vpop.eup %636 }
  0xb7   :  { %v109_v43 = vmul.f32 %v637_v41, %v81_v20 }
  0xb9   :  { %v581_v44 = vpack.c.bf16 %v109_v43, %v108_v42  ;;  %v273_v42 = vpop.permute.xlu1 %272 }
  0xbb   :  { %582 = vmatprep.subr.bf16.mxu0 %v581_v44 }
  0xbc   :  { %584 = vmatpush3.bf16.msra.mxu0 %v581_v44 }
  0xbd   :  { %v639_v45 = vpop.eup %638 }
  0xbe   :  { %v641_v46 = vpop.eup %640  ;;  %v110_v47 = vmul.f32 %v639_v45, %v82_v27  ;;  %v261_v27 = vld [vmem:[#allocation2 + $0x30] sm:$0xff] }
  0xbf   :  { %v111_v48 = vmul.f32 %v641_v46, %v83_v29  ;;  %v729_v29 = vmov 0.0|0.0  }
  0xc1   :  { %v585_v49 = vpack.c.bf16 %v111_v48, %v110_v47 }
  0xc3   :  { %586 = vmatprep.subr.bf16.mxu0 %v585_v49 }
  0xc4   :  { %588 = vmatpush3.bf16.msra.mxu0 %v585_v49 }
  0xc5   :  { %597 = vmatprep.subr.bf16.mxu0 %v729_v29 }
  0xc7   :  { %551 = vmatmul.mubr.msk.f32.vlgmr.msra.gmra.mrb[0].mxu0 %vm132_vm0, %v113_v50 }
  0xc8   :  { %553 = vmatprep.mubr.msk.f32.mxu0 %vm132_vm0, %v114_v51 }
  0xcb   :  { %554 = vmatmul.mubr.msk.f32.gmra.mrb[2].mxu0 %vm132_vm0, %v115_v52 }
  0xcc   :  { %578 = vmatprep.mubr.msk.f32.mxu0 %vm730_vm1, %v731_v30 }
 0x19a   :  { %v552_v58 = vpop.f32.mrb[0].mxu0 }
 0x19b   :  { %v217_v59 = vadd.f32 %v552_v58, %v122_v57  ;;  %v211_v60 = vpop.f32.mrb[1].mxu0 }
 0x19c   :  { %v212_v61 = vadd.f32 %v211_v60, %v118_v55 }
 0x19d   :  { %v509_v62 = vmul.f32 -1.442695, %v217_v59 }
 0x19e   :  { %v508_v0 = vmul.f32 -1.442695, %v212_v61  ;;  %v555_v1 = vpop.f32.mrb[2].mxu0 }
 0x19f   :  { %642 = vpow2.f32 %v509_v62  ;;  %v227_v6 = vadd.f32 %v555_v1, %v130_v63  ;;  %v221_v3 = vpop.f32.mrb[3].mxu0  ;;  %v404_v1 = vld [vmem:[%s829_s2] sm:$0xff] }
 0x1a0   :  { %644 = vpow2.f32 %v508_v0  ;;  %v222_v7 = vadd.f32 %v221_v3, %v126_v56 }
 0x1a1   :  { %v511_v8 = vmul.f32 -1.442695, %v227_v6 }
 0x1a2   :  { %v510_v4 = vmul.f32 -1.442695, %v222_v7 }
 0x1a3   :  { %646 = vpow2.f32 %v511_v8 }
 0x1a4   :  { %648 = vpow2.f32 %v510_v4 }
 0x1a9   :  { %v643_v5 = vpop.eup %642 }
 0x1aa   :  { %v645_v9 = vpop.eup %644  ;;  %v243_v10 = vadd.f32 1.0, %v643_v5 }
 0x1ab   :  { %v242_v11 = vadd.f32 1.0, %v645_v9 }
 0x1ac   :  { %650 = vrcp.f32 %v243_v10 }
 0x1ad   :  { %v647_v12 = vpop.eup %646  ;;  %652 = vrcp.f32 %v242_v11 }
 0x1ae   :  { %v649_v13 = vpop.eup %648  ;;  %v245_v14 = vadd.f32 1.0, %v647_v12 }
 0x1af   :  { %v244_v15 = vadd.f32 1.0, %v649_v13 }
 0x1b0   :  { %654 = vrcp.f32 %v245_v14 }
 0x1b1   :  { %656 = vrcp.f32 %v244_v15 }
 0x1b6   :  { %v651_v16 = vpop.eup %650 }
 0x1b7   :  { %v653_v17 = vpop.eup %652  ;;  %v255_v18 = vmul.f32 %v651_v16, %v217_v59 }
 0x1b8   :  { %v254_v19 = vmul.f32 %v653_v17, %v212_v61 }
 0x1ba   :  { %v655_v20 = vpop.eup %654  ;;  %v589_v21 = vpack.c.bf16 %v255_v18, %v254_v19 }
 0x1bb   :  { %v657_v22 = vpop.eup %656  ;;  %v257_v23 = vmul.f32 %v655_v20, %v227_v6  ;;  %v409_v6 = vpop.permute.xlu1 %408 }
 0x1bc   :  { %v256_v24 = vmul.f32 %v657_v22, %v222_v7  ;;  %590 = vmatprep.subr.bf16.mxu1 %v589_v21 }
 0x1bd   :  { %592 = vmatpush3.bf16.msra.mxu1 %v589_v21 }
 0x1be   :  { %v593_v25 = vpack.c.bf16 %v257_v23, %v256_v24 }
 0x1c0   :  { %594 = vmatprep.subr.bf16.mxu1 %v593_v25 }
 0x1c1   :  { %596 = vmatpush3.bf16.msra.mxu1 %v593_v25 }
 0x1c4   :  { %565 = vmatmul.mubr.msk.f32.vlgmr.msra.gmra.mrb[0].mxu1 %vm132_vm0, %v260_v26 }
 0x1c5   :  { %567 = vmatprep.mubr.msk.f32.mxu1 %vm132_vm0, %v261_v27 }
 0x1c8   :  { %568 = vmatmul.mubr.msk.f32.gmra.mrb[2].mxu1 %vm132_vm0, %v262_v28 }
 0x297   :  { %v566_v34 = vpop.f32.mrb[0].mxu1 }
 0x298   :  { %v363_v35 = vadd.f32 %v566_v34, %v269_v33  ;;  %v357_v36 = vpop.f32.mrb[1].mxu1 }
 0x299   :  { %v358_v37 = vadd.f32 %v357_v36, %v265_v32 }
 0x29a   :  { %v517_v38 = vmul.f32 -1.442695, %v363_v35 }
 0x29b   :  { %v516_v39 = vmul.f32 -1.442695, %v358_v37  ;;  %v569_v41 = vpop.f32.mrb[2].mxu1 }
 0x29c   :  { %658 = vpow2.f32 %v517_v38  ;;  %v373_v43 = vadd.f32 %v569_v41, %v277_v40  ;;  %v367_v44 = vpop.f32.mrb[3].mxu1 }
 0x29d   :  { %660 = vpow2.f32 %v516_v39  ;;  %v368_v45 = vadd.f32 %v367_v44, %v273_v42 }
 0x29e   :  { %v519_v46 = vmul.f32 -1.442695, %v373_v43 }
 0x29f   :  { %v518_v47 = vmul.f32 -1.442695, %v368_v45 }
 0x2a0   :  { %662 = vpow2.f32 %v519_v46 }
 0x2a1   :  { %664 = vpow2.f32 %v518_v47 }
 0x2a6   :  { %v659_v2 = vpop.eup %658 }
 0x2a7   :  { %v661_v48 = vpop.eup %660  ;;  %v389_v49 = vadd.f32 1.0, %v659_v2 }
 0x2a8   :  { %v388_v50 = vadd.f32 1.0, %v661_v48 }
 0x2a9   :  { %666 = vrcp.f32 %v389_v49 }
 0x2aa   :  { %v663_v51 = vpop.eup %662  ;;  %668 = vrcp.f32 %v388_v50 }
 0x2ab   :  { %v665_v52 = vpop.eup %664  ;;  %v391_v53 = vadd.f32 1.0, %v663_v51 }
 0x2ac   :  { %v390_v54 = vadd.f32 1.0, %v665_v52 }
 0x2ad   :  { %670 = vrcp.f32 %v391_v53 }
 0x2ae   :  { %672 = vrcp.f32 %v390_v54 }
 0x2b3   :  { %v667_v55 = vpop.eup %666 }
 0x2b4   :  { %v669_v56 = vpop.eup %668  ;;  %v401_v57 = vmul.f32 %v667_v55, %v363_v35 }
 0x2b5   :  { %v400_v58 = vmul.f32 %v669_v56, %v358_v37 }
 0x2b7   :  { %v671_v59 = vpop.eup %670  ;;  %v598_v60 = vpack.c.bf16 %v401_v57, %v400_v58 }
 0x2b8   :  { %v673_v61 = vpop.eup %672  ;;  %v403_v62 = vmul.f32 %v671_v59, %v373_v43 }
 0x2b9   :  { %v402_v63 = vmul.f32 %v673_v61, %v368_v45  ;;  %599 = vmatpush3.bf16.msra.mxu0 %v598_v60 }
 0x2ba   :  { %600 = vmatprep.subr.bf16.mxu0 %v729_v29 }
 0x2bb   :  { %v601_v0 = vpack.c.bf16 %v403_v62, %v402_v63 }
 0x2bd   :  { %602 = vmatpush3.bf16.msra.mxu0 %v601_v0 }
 0x2c0   :  { %579 = vmatmul.mubr.msk.f32.vlgmr.msra.gmra.mrb[4].mxu0 %vm132_vm0, %v404_v1 }
 0x393   :  { %v480_v3 = vpop.f32.mrb[4].mxu0 }
 0x394   :  { %v481_v7 = vadd.f32 %v480_v3, %v409_v6  ;;  %v580_v8 = vpop.f32.mrb[5].mxu0 }
 0x396   :  { %484 = vst [vmem:[#allocation5] sm:$0xff] %v481_v7 }
 0x397   :  { %707 = shalt.err (!%p704_p12)
}
 0x398   :  { %s708_s2 = scalar_lea.hbm %s830_s3, 128 }
 0x399   :  { %p709_p13 = scmp.ne.s32.totalorder %s830_s3, %s708_s2  ;;  %p712_p0 = scmp.lt.u32.totalorder %s708_s2, %s830_s3 }
 0x39b   :  { %p714_p1 = pnand %p712_p0, %p709_p13 }
 0x39d   :  { %717 = shalt.err (!%p714_p1)
}
 0x39e   :  { %494 = dma.vmem_to_hbm [thread:$0]  %s492_s8, 128, %s830_s3, [#allocation4]  }
 0x39f   :  { %720 = dma.done.wait [#allocation4], 128  }
 0x3a0   :  { %721 = vsyncadd [#allocation4], 4294967168 }
 0x3a1   :  { %498 = vsyncpa [#allocation3], 1 }
 0x3a2   :  { %499 = vsyncpa [#allocation4], 1 }

</bundles_post_ra>
